<compile_context>
chip_gen: v5e
topology: v5e:2x2
jax: 0.10.0
libtpu: 0.0.40
codegen_flags: <defaults>
</compile_context>

<pallas_src>
import jax
import jax.numpy as jnp
from jax.experimental import pallas as pl
from jax.experimental.pallas import tpu as pltpu


def mlp_kernel(x_ref, w0_ref, b0_ref, w1_ref, b1_ref, wl_ref, bl_ref, out_ref):
    # Hidden layer 0 (normalization pre-folded into w0/b0): linear + relu.
    h = jnp.dot(x_ref[...], w0_ref[...], preferred_element_type=jnp.float32)
    h = jnp.maximum(h + b0_ref[...], 0.0)

    # Hidden layer 1: linear + relu.
    h = jnp.dot(h, w1_ref[...], preferred_element_type=jnp.float32)
    h = jnp.maximum(h + b1_ref[...], 0.0)

    # Last fc: linear, identity output activation.
    out = jnp.dot(h, wl_ref[...], preferred_element_type=jnp.float32) + bl_ref[...]
    out_ref[...] = out.astype(out_ref.dtype)


def _round_up(n, m):
    return ((n + m - 1) // m) * m


def mlp_forward(x, input_mu, input_std, w0, b0, w1, b1, w_last, b_last,
                *, batch_tile=4096):
    """Functional equivalent of Mlp.forward for hidden_sizes of length 2.

    x:            [B, IN]
    input_mu/std: [1, IN]
    w0:[IN,H0] b0:[1,H0]   w1:[H0,H1] b1:[1,H1]   w_last:[H1,OUT] b_last:[1,OUT]
    (weights stored pre-transposed as [in_features, out_features])
    """
    B, IN = x.shape
    H0 = w0.shape[1]
    H1 = w1.shape[1]
    OUT = w_last.shape[1]

    # ---- Host-side parameter prep -------------------------------------------
    # Fold (x - mu) / std into layer 0:  ((x - mu)/std) @ W0 + b0
    #   == x @ (diag(1/std) @ W0) + (b0 - (mu/std) @ W0)
    # Guard against ~0 std (fit_input_stats floors std at 1e-12).
    std_safe = jnp.maximum(input_std, 1e-12)
    inv_std = 1.0 / std_safe                        # [1, IN]
    w0f = w0 * inv_std.reshape(IN, 1)               # [IN, H0]
    b0f = b0 - (input_mu * inv_std) @ w0            # [1, H0]

    # Zero-pad hidden widths to lane-dense multiples of 128. ReLU keeps the
    # padded columns at exactly zero, so the result is unchanged.
    LANE = 128
    H0P = _round_up(H0, LANE)
    H1P = _round_up(H1, LANE)
    w0p = jnp.pad(w0f, ((0, 0), (0, H0P - H0)))
    b0p = jnp.pad(b0f, ((0, 0), (0, H0P - H0)))
    w1p = jnp.pad(w1, ((0, H0P - H0), (0, H1P - H1)))
    b1p = jnp.pad(b1, ((0, 0), (0, H1P - H1)))
    wlp = jnp.pad(w_last, ((0, H1P - H1), (0, 0)))
    # Output stays unpadded: OUT equals the full last dim, so (TB, OUT) blocks
    # are legal and we only write the useful bytes back to HBM.

    # ---- Batch tiling ---------------------------------------------------------
    SUB = 8
    B_pad = _round_up(B, SUB)                        # sublane-aligned batch
    x_in = jnp.pad(x, ((0, B_pad - B), (0, 0))) if B_pad != B else x

    if B_pad <= 256:
        TB = min(B_pad, batch_tile)
    else:
        # >= 2 grid steps so the "parallel" axis shards across v7x's 2 TCs;
        # keep the tile a multiple of 256 for clean MXU passes.
        TB = min(batch_tile, _round_up(pl.cdiv(B_pad, 2), 256))
    TB = _round_up(min(TB, B_pad), SUB)
    grid = (pl.cdiv(B_pad, TB),)

    # Cost estimate in terms of the *useful* (unpadded) work.
    flops = 2 * B * (IN * H0 + H0 * H1 + H1 * OUT)
    bytes_accessed = 4 * (B * IN + IN * H0 + H0 + H0 * H1 + H1
                          + H1 * OUT + OUT + B * OUT)

    out = pl.pallas_call(
        mlp_kernel,
        out_shape=jax.ShapeDtypeStruct((B_pad, OUT), jnp.float32),
        grid=grid,
        in_specs=[
            # x: tiled over batch.
            pl.BlockSpec((TB, IN), lambda i: (i, 0)),
            # Weights / biases: constant index_map -> resident across grid steps.
            pl.BlockSpec((IN, H0P), lambda i: (0, 0)),
            pl.BlockSpec((1, H0P), lambda i: (0, 0)),
            pl.BlockSpec((H0P, H1P), lambda i: (0, 0)),
            pl.BlockSpec((1, H1P), lambda i: (0, 0)),
            pl.BlockSpec((H1P, OUT), lambda i: (0, 0)),
            pl.BlockSpec((1, OUT), lambda i: (0, 0)),
        ],
        out_specs=pl.BlockSpec((TB, OUT), lambda i: (i, 0)),
        compiler_params=pltpu.CompilerParams(
            dimension_semantics=("parallel",),
            vmem_limit_bytes=32 * 1024 * 1024),
        cost_estimate=pl.CostEstimate(
            flops=flops, transcendentals=0, bytes_accessed=bytes_accessed),
    )(x_in, w0p, b0p, w1p, b1p, wlp, b_last)

    return out[:B] if B_pad != B else out


def fanin_init(key, shape):
    # ptu.fanin_init: uniform(-1/sqrt(fan_in), 1/sqrt(fan_in)); torch weight is
    # [out, in] with fan_in = in; our transposed weight is [in, out] -> fan_in = shape[0].
    bound = 1.0 / jnp.sqrt(shape[0])
    return jax.random.uniform(key, shape, jnp.float32, minval=-bound, maxval=bound)


def _reference(x, mu, std, w0, b0, w1, b1, wl, bl):
    # Pure-JAX reference following the torch forward exactly.
    h = (x - mu) / std
    h = jnp.maximum(h @ w0 + b0, 0.0)
    h = jnp.maximum(h @ w1 + b1, 0.0)
    return h @ wl + bl


if __name__ == "__main__":
    # Shapes consistent with the module: batch=2, input_size=16,
    # hidden_sizes=(32, 32), output_size=8.
    B, IN, H0, H1, OUT = 2, 16, 32, 32, 8
    init_w = 0.003
    b_init_value = 0.0

    key = jax.random.PRNGKey(0)
    k_x, k_w0, k_w1, k_wl, k_bl, k_mu, k_std, k_x2, k_x3 = jax.random.split(key, 9)

    x = jax.random.normal(k_x, (B, IN), jnp.float32)

    # Non-trivial input stats (as if fit_input_stats had been called) to
    # exercise the normalization folding.
    input_mu = 0.1 * jax.random.normal(k_mu, (1, IN), jnp.float32)
    input_std = jax.random.uniform(k_std, (1, IN), jnp.float32,
                                   minval=0.5, maxval=1.5)

    # Hidden fcs: fanin_init weights, bias filled with b_init_value.
    w0 = fanin_init(k_w0, (IN, H0))
    b0 = jnp.full((1, H0), b_init_value, jnp.float32)
    w1 = fanin_init(k_w1, (H0, H1))
    b1 = jnp.full((1, H1), b_init_value, jnp.float32)

    # last_fc: uniform(-init_w, init_w) for weight and bias (final_init_scale=None).
    w_last = jax.random.uniform(k_wl, (H1, OUT), jnp.float32,
                                minval=-init_w, maxval=init_w)
    b_last = jax.random.uniform(k_bl, (1, OUT), jnp.float32,
                                minval=-init_w, maxval=init_w)

    # --- Primary small-shape check (single grid step) -------------------------
    out = mlp_forward(x, input_mu, input_std, w0, b0, w1, b1, w_last, b_last)
    out = jax.block_until_ready(out)
    ref = _reference(x, input_mu, input_std, w0, b0, w1, b1, w_last, b_last)
    assert out.shape == (B, OUT)
    assert jnp.allclose(out, ref, atol=1e-5, rtol=1e-5)

    # --- Secondary check: multi-step grid, batch padding (41 -> 48), tile 16 --
    B2 = 41
    x2 = jax.random.normal(k_x2, (B2, IN), jnp.float32)
    out2 = mlp_forward(x2, input_mu, input_std, w0, b0, w1, b1, w_last, b_last,
                       batch_tile=16)
    out2 = jax.block_until_ready(out2)
    ref2 = _reference(x2, input_mu, input_std, w0, b0, w1, b1, w_last, b_last)
    assert out2.shape == (B2, OUT)
    assert jnp.allclose(out2, ref2, atol=1e-5, rtol=1e-5)

    # --- Third check: B > 256 path (>= 2 grid steps, 256-multiple tile) -------
    B3 = 300
    x3 = jax.random.normal(k_x3, (B3, IN), jnp.float32)
    out3 = mlp_forward(x3, input_mu, input_std, w0, b0, w1, b1, w_last, b_last)
    out3 = jax.block_until_ready(out3)
    ref3 = _reference(x3, input_mu, input_std, w0, b0, w1, b1, w_last, b_last)
    assert out3.shape == (B3, OUT)
    assert jnp.allclose(out3, ref3, atol=1e-5, rtol=1e-5)

    print("KERNEL_OK")
</pallas_src>

<mosaic_0001>
module attributes {stable_mosaic.version = 11 : i64} {
  func.func @mlp_kernel(%arg0: i32, %arg1: memref<8x16xf32, #tpu.memory_space<vmem>>, %arg2: memref<16x128xf32, #tpu.memory_space<vmem>>, %arg3: memref<1x128xf32, #tpu.memory_space<vmem>>, %arg4: memref<128x128xf32, #tpu.memory_space<vmem>>, %arg5: memref<1x128xf32, #tpu.memory_space<vmem>>, %arg6: memref<128x8xf32, #tpu.memory_space<vmem>>, %arg7: memref<1x8xf32, #tpu.memory_space<vmem>>, %arg8: memref<8x8xf32, #tpu.memory_space<vmem>>) attributes {dimension_semantics = [#tpu.dimension_semantics<parallel>], iteration_bounds = array<i64: 1>, scalar_prefetch = 0 : i64, scratch_operands = 0 : i64, tpu.core_type = #tpu.core_type<tc>, window_params = [{transform_indices = @transform_0, window_bounds = array<i64: 8, 16>}, {pipeline_mode = #tpu.pipeline_mode<synchronous>, transform_indices = @transform_1, window_bounds = array<i64: 16, 128>}, {pipeline_mode = #tpu.pipeline_mode<synchronous>, transform_indices = @transform_2, window_bounds = array<i64: 1, 128>}, {pipeline_mode = #tpu.pipeline_mode<synchronous>, transform_indices = @transform_3, window_bounds = array<i64: 128, 128>}, {pipeline_mode = #tpu.pipeline_mode<synchronous>, transform_indices = @transform_4, window_bounds = array<i64: 1, 128>}, {pipeline_mode = #tpu.pipeline_mode<synchronous>, transform_indices = @transform_5, window_bounds = array<i64: 128, 8>}, {pipeline_mode = #tpu.pipeline_mode<synchronous>, transform_indices = @transform_6, window_bounds = array<i64: 1, 8>}, {transform_indices = @transform_7, window_bounds = array<i64: 8, 8>}]} {
    %c0 = arith.constant 0 : index
    %c0_0 = arith.constant 0 : index
    %0 = vector.load %arg1[%c0, %c0_0] : memref<8x16xf32, #tpu.memory_space<vmem>>, vector<8x16xf32>
    %c0_1 = arith.constant 0 : index
    %c0_2 = arith.constant 0 : index
    %1 = vector.load %arg2[%c0_1, %c0_2] : memref<16x128xf32, #tpu.memory_space<vmem>>, vector<16x128xf32>
    %cst = arith.constant dense<0.000000e+00> : vector<8x128xf32>
    %2 = tpu.matmul %0, %1, %cst {dimension_numbers = #tpu.dot_dimension_numbers<[1], [0], [0], [1], [0, 0, 1, 1], [], []>} : vector<8x16xf32>, vector<16x128xf32>, vector<8x128xf32> -> vector<8x128xf32>
    %c0_3 = arith.constant 0 : index
    %c0_4 = arith.constant 0 : index
    %3 = vector.load %arg3[%c0_3, %c0_4] : memref<1x128xf32, #tpu.memory_space<vmem>>, vector<1x128xf32>
    %4 = vector.broadcast %3 : vector<1x128xf32> to vector<8x128xf32>
    %5 = arith.addf %2, %4 : vector<8x128xf32>
    %cst_5 = arith.constant 0.000000e+00 : f32
    %6 = vector.broadcast %cst_5 : f32 to vector<8x128xf32>
    %7 = arith.maximumf %5, %6 : vector<8x128xf32>
    %c0_6 = arith.constant 0 : index
    %c0_7 = arith.constant 0 : index
    %8 = vector.load %arg4[%c0_6, %c0_7] : memref<128x128xf32, #tpu.memory_space<vmem>>, vector<128x128xf32>
    %cst_8 = arith.constant dense<0.000000e+00> : vector<8x128xf32>
    %9 = tpu.matmul %7, %8, %cst_8 {dimension_numbers = #tpu.dot_dimension_numbers<[1], [0], [0], [1], [0, 0, 1, 1], [], []>} : vector<8x128xf32>, vector<128x128xf32>, vector<8x128xf32> -> vector<8x128xf32>
    %c0_9 = arith.constant 0 : index
    %c0_10 = arith.constant 0 : index
    %10 = vector.load %arg5[%c0_9, %c0_10] : memref<1x128xf32, #tpu.memory_space<vmem>>, vector<1x128xf32>
    %11 = vector.broadcast %10 : vector<1x128xf32> to vector<8x128xf32>
    %12 = arith.addf %9, %11 : vector<8x128xf32>
    %cst_11 = arith.constant 0.000000e+00 : f32
    %13 = vector.broadcast %cst_11 : f32 to vector<8x128xf32>
    %14 = arith.maximumf %12, %13 : vector<8x128xf32>
    %c0_12 = arith.constant 0 : index
    %c0_13 = arith.constant 0 : index
    %15 = vector.load %arg6[%c0_12, %c0_13] : memref<128x8xf32, #tpu.memory_space<vmem>>, vector<128x8xf32>
    %cst_14 = arith.constant dense<0.000000e+00> : vector<8x8xf32>
    %16 = tpu.matmul %14, %15, %cst_14 {dimension_numbers = #tpu.dot_dimension_numbers<[1], [0], [0], [1], [0, 0, 1, 1], [], []>} : vector<8x128xf32>, vector<128x8xf32>, vector<8x8xf32> -> vector<8x8xf32>
    %c0_15 = arith.constant 0 : index
    %c0_16 = arith.constant 0 : index
    %17 = vector.load %arg7[%c0_15, %c0_16] : memref<1x8xf32, #tpu.memory_space<vmem>>, vector<1x8xf32>
    %18 = vector.broadcast %17 : vector<1x8xf32> to vector<8x8xf32>
    %19 = arith.addf %16, %18 : vector<8x8xf32>
    %c0_17 = arith.constant 0 : index
    %c0_18 = arith.constant 0 : index
    %20 = vector.load %arg8[%c0_17, %c0_18] : memref<8x8xf32, #tpu.memory_space<vmem>>, vector<8x8xf32>
    tpu.vector_store %arg8[%c0_17, %c0_18], %19 {strides = array<i32>} : memref<8x8xf32, #tpu.memory_space<vmem>>, vector<8x8xf32>,
    return
  }
  func.func @transform_0(%arg0: i32) -> (i32, i32) {
    %c0_i32 = arith.constant 0 : i32
    %c0_i32_0 = arith.constant 0 : i32
    return %arg0, %c0_i32 : i32, i32
  }
  func.func @transform_1(%arg0: i32) -> (i32, i32) {
    %c0_i32 = arith.constant 0 : i32
    %c0_i32_0 = arith.constant 0 : i32
    %c0_i32_1 = arith.constant 0 : i32
    return %c0_i32, %c0_i32_0 : i32, i32
  }
  func.func @transform_2(%arg0: i32) -> (i32, i32) {
    %c0_i32 = arith.constant 0 : i32
    %c0_i32_0 = arith.constant 0 : i32
    %c0_i32_1 = arith.constant 0 : i32
    return %c0_i32, %c0_i32_0 : i32, i32
  }
  func.func @transform_3(%arg0: i32) -> (i32, i32) {
    %c0_i32 = arith.constant 0 : i32
    %c0_i32_0 = arith.constant 0 : i32
    %c0_i32_1 = arith.constant 0 : i32
    return %c0_i32, %c0_i32_0 : i32, i32
  }
  func.func @transform_4(%arg0: i32) -> (i32, i32) {
    %c0_i32 = arith.constant 0 : i32
    %c0_i32_0 = arith.constant 0 : i32
    %c0_i32_1 = arith.constant 0 : i32
    return %c0_i32, %c0_i32_0 : i32, i32
  }
  func.func @transform_5(%arg0: i32) -> (i32, i32) {
    %c0_i32 = arith.constant 0 : i32
    %c0_i32_0 = arith.constant 0 : i32
    %c0_i32_1 = arith.constant 0 : i32
    return %c0_i32, %c0_i32_0 : i32, i32
  }
  func.func @transform_6(%arg0: i32) -> (i32, i32) {
    %c0_i32 = arith.constant 0 : i32
    %c0_i32_0 = arith.constant 0 : i32
    %c0_i32_1 = arith.constant 0 : i32
    return %c0_i32, %c0_i32_0 : i32, i32
  }
  func.func @transform_7(%arg0: i32) -> (i32, i32) {
    %c0_i32 = arith.constant 0 : i32
    %c0_i32_0 = arith.constant 0 : i32
    return %arg0, %c0_i32 : i32, i32
  }
}

</mosaic_0001>

<bundles_post_ra>
// kernel: tpu_custom_call.1
= control target key start
LH: loop header
LB: loop body
LE: loop exit
PB: predicated region body
PF: predicated region fallthrough
CT: control target
= control target key end

     0   :  { %12 = vsyncpa [#allocation3], 0  ;;  %s393_s0 = inlined_call_operand.vmem [shape: f32[8,16], index: 0, kind: input, shape index: {}]   ;;  %s394_s1 = inlined_call_operand.hbm [shape: f32[16,128], index: 1, kind: input, shape index: {}]   ;;  %s395_s2 = inlined_call_operand.vmem [shape: f32[1,128], index: 2, kind: input, shape index: {}]   ;;  %s396_s3 = inlined_call_operand.vmem [shape: f32[128,128], index: 3, kind: input, shape index: {}]   ;;  %s397_s4 = inlined_call_operand.vmem [shape: f32[1,128], index: 4, kind: input, shape index: {}]   ;;  %s398_s5 = inlined_call_operand.vmem [shape: f32[128,8], index: 5, kind: input, shape index: {}]   ;;  %s399_s6 = inlined_call_operand.vmem [shape: f32[1,8], index: 6, kind: input, shape index: {}]   ;;  %s400_s7 = inlined_call_operand.hbm [shape: f32[8,8], index: 7, kind: output, shape index: {}]  }
   0x1   :  { %13 = vsyncpa [#allocation4], 0  ;;  %s20_s26 = sshll.u32 %s394_s1, 4  ;;  %s235_s27 = smov [#allocation2]   ;;  %s21_s26 = int_to_ptr.hbm [resolvable:$true] %s20_s26 }
   0x2   :  { %s22_s28 = sshll.u32 %s235_s27, 4  ;;  %s236_s29 = smov 128   ;;  %s23_s28 = int_to_ptr.vmem [resolvable:$true] %s22_s28 }
   0x3   :  { %s237_s30 = smov 8  }
   0x4   :  { %28 = dma.hbm_to_vmem [thread:$0]  %s21_s26, 256, %s23_s28, [#allocation3], %s236_s29, %s236_s29, %s237_s30  }
   0x5   :  { %231 = dma.done.wait [#allocation3], 256  }
   0x6   :  { %232 = vsyncadd [#allocation3], 4294967040  ;;  %v45_v0 = vld [vmem:[#allocation2 + $0x8] sm:$0xff]  ;;  %v44_v1 = vld [vmem:[#allocation2] sm:$0xff]  ;;  %vm50_vm0 = vcmask 130048   ;;  %s238_s25 = smov [#allocation5]  }
   0x7   :  { %68 = vmatpush.msra.mxu0 %v45_v0  ;;  %v43_v2 = vld [vmem:[%s393_s0] sm:$0xff]  ;;  %v90_v3 = vld [vmem:[%s396_s3 + $0x78] sm:$0xff]  ;;  %v89_v4 = vld [vmem:[%s396_s3 + $0x70] sm:$0xff]  ;;  %s163_s26 = sshll.u32 %s238_s25, 4  ;;  %s165_s29 = sshll.u32 %s400_s7, 4  ;;  %vm156_vm1 = vcmask 64512   ;;  %s164_s26 = int_to_ptr.vmem [resolvable:$true] %s163_s26  ;;  %s166_s29 = int_to_ptr.hbm [resolvable:$true] %s165_s29 }
   0x8   :  { %95 = vmatpush.msra.mxu1 %v90_v3  ;;  %v88_v5 = vld [vmem:[%s396_s3 + $0x68] sm:$0xff]  ;;  %v87_v6 = vld [vmem:[%s396_s3 + $0x60] sm:$0xff]  ;;  %v86_v7 = vld [vmem:[%s396_s3 + $0x58] sm:$0xff] }
   0x9   :  { %69 = vmatpush.msra.mxu0 %v44_v1  ;;  %v85_v8 = vld [vmem:[%s396_s3 + $0x50] sm:$0xff]  ;;  %v84_v9 = vld [vmem:[%s396_s3 + $0x48] sm:$0xff]  ;;  %v83_v10 = vld [vmem:[%s396_s3 + $0x40] sm:$0xff] }
   0xa   :  { %175 = vmatmul.msk.f32.vlgmr.msra.gmra.mxu0 %vm50_vm0, %v43_v2  ;;  %96 = vmatpush.msra.mxu1 %v89_v4  ;;  %v82_v11 = vld [vmem:[%s396_s3 + $0x38] sm:$0xff]  ;;  %v81_v12 = vld [vmem:[%s396_s3 + $0x30] sm:$0xff]  ;;  %v80_v13 = vld [vmem:[%s396_s3 + $0x28] sm:$0xff] }
   0xb   :  { %v79_v14 = vld [vmem:[%s396_s3 + $0x20] sm:$0xff]  ;;  %v78_v15 = vld [vmem:[%s396_s3 + $0x18] sm:$0xff]  ;;  %v77_v16 = vld [vmem:[%s396_s3 + $0x10] sm:$0xff] }
   0xc   :  { %97 = vmatpush.msra.mxu1 %v88_v5  ;;  %v76_v17 = vld [vmem:[%s396_s3 + $0x8] sm:$0xff]  ;;  %v75_v18 = vld [vmem:[%s396_s3] sm:$0xff]  ;;  %v131_v19 = vld [vmem:[%s398_s5 + $0x78] sm:$0xff] }
   0xd   :  { %v130_v20 = vld [vmem:[%s398_s5 + $0x70] sm:$0xff]  ;;  %136 = vmatpush.msra.mxu2 %v131_v19  ;;  %v129_v21 = vld [vmem:[%s398_s5 + $0x68] sm:$0xff]  ;;  %v128_v22 = vld [vmem:[%s398_s5 + $0x60] sm:$0xff] }
   0xe   :  { %98 = vmatpush.msra.mxu1 %v87_v6  ;;  %v127_v23 = vld [vmem:[%s398_s5 + $0x58] sm:$0xff]  ;;  %v126_v24 = vld [vmem:[%s398_s5 + $0x50] sm:$0xff]  ;;  %v125_v25 = vld [vmem:[%s398_s5 + $0x48] sm:$0xff] }
   0xf   :  { %137 = vmatpush.msra.mxu2 %v130_v20  ;;  %v124_v26 = vld [vmem:[%s398_s5 + $0x40] sm:$0xff]  ;;  %v123_v27 = vld [vmem:[%s398_s5 + $0x38] sm:$0xff]  ;;  %v122_v28 = vld [vmem:[%s398_s5 + $0x30] sm:$0xff] }
  0x10   :  { %99 = vmatpush.msra.mxu1 %v86_v7  ;;  %v121_v29 = vld [vmem:[%s398_s5 + $0x28] sm:$0xff]  ;;  %v120_v30 = vld [vmem:[%s398_s5 + $0x20] sm:$0xff]  ;;  %v119_v31 = vld [vmem:[%s398_s5 + $0x18] sm:$0xff] }
  0x11   :  { %138 = vmatpush.msra.mxu2 %v129_v21  ;;  %v180_v32 = vld [vmem:[%s395_s2] ss:$0 sm:$0xff]  ;;  %v118_v36 = vld [vmem:[%s398_s5 + $0x10] sm:$0xff]  ;;  %v117_v37 = vld [vmem:[%s398_s5 + $0x8] sm:$0xff] }
  0x12   :  { %100 = vmatpush.msra.mxu1 %v85_v8  ;;  %v116_v38 = vld [vmem:[%s398_s5] sm:$0xff] }
  0x13   :  { %139 = vmatpush.msra.mxu2 %v128_v22  ;;  %v181_v39 = vld [vmem:[%s397_s4] ss:$0 sm:$0xff] }
  0x14   :  { %101 = vmatpush.msra.mxu1 %v84_v9  ;;  %v182_v43 = vld [vmem:[%s399_s6] ss:$0 sm:$0xff] }
  0x15   :  { %140 = vmatpush.msra.mxu2 %v127_v23 }
  0x16   :  { %102 = vmatpush.msra.mxu1 %v83_v10 }
  0x17   :  { %141 = vmatpush.msra.mxu2 %v126_v24 }
  0x18   :  { %103 = vmatpush.msra.mxu1 %v82_v11 }
  0x19   :  { %142 = vmatpush.msra.mxu2 %v125_v25 }
  0x1a   :  { %104 = vmatpush.msra.mxu1 %v81_v12 }
  0x1b   :  { %143 = vmatpush.msra.mxu2 %v124_v26 }
  0x1c   :  { %105 = vmatpush.msra.mxu1 %v80_v13 }
  0x1d   :  { %144 = vmatpush.msra.mxu2 %v123_v27 }
  0x1e   :  { %106 = vmatpush.msra.mxu1 %v79_v14 }
  0x1f   :  { %145 = vmatpush.msra.mxu2 %v122_v28 }
  0x20   :  { %107 = vmatpush.msra.mxu1 %v78_v15 }
  0x21   :  { %146 = vmatpush.msra.mxu2 %v121_v29 }
  0x22   :  { %108 = vmatpush.msra.mxu1 %v77_v16 }
  0x23   :  { %147 = vmatpush.msra.mxu2 %v120_v30 }
  0x24   :  { %109 = vmatpush.msra.mxu1 %v76_v17 }
  0x25   :  { %148 = vmatpush.msra.mxu2 %v119_v31 }
  0x26   :  { %110 = vmatpush.msra.mxu1 %v75_v18 }
  0x27   :  { %149 = vmatpush.msra.mxu2 %v118_v36 }
  0x29   :  { %150 = vmatpush.msra.mxu2 %v117_v37 }
  0x2b   :  { %151 = vmatpush.msra.mxu2 %v116_v38 }
  0x87   :  { %v71_v33 = vpop.f32.mrf.mxu0 }
  0x88   :  { %v72_v34 = vadd.f32 %v180_v32, %v71_v33 }
  0x8a   :  { %v74_v35 = vmax.f32 %v72_v34, 0.0 }
  0x8c   :  { %111 = vmatmul.f32.vlgmr.msra.gmra.mxu1 %v74_v35 }
 0x109   :  { %v112_v40 = vpop.f32.mrf.mxu1 }
 0x10a   :  { %v113_v41 = vadd.f32 %v181_v39, %v112_v40 }
 0x10c   :  { %v115_v42 = vmax.f32 %v113_v41, 0.0 }
 0x10e   :  { %152 = vmatmul.f32.vlgmr.msra.gmra.mxu2 %v115_v42 }
 0x191   :  { %v153_v44 = vpop.f32.mrf.mxu2 }
 0x192   :  { %v154_v45 = vadd.f32 %v182_v43, %v153_v44 }
 0x194   :  { %157 = vst.msk [vmem:[#allocation5] sm:$0xff] %vm156_vm1, %v154_v45 }
 0x195   :  { %168 = dma.vmem_to_hbm [thread:$0]  %s164_s26, 128, %s166_s29, [#allocation4]  }
 0x196   :  { %233 = dma.done.wait [#allocation4], 128  }
 0x197   :  { %234 = vsyncadd [#allocation4], 4294967168 }
 0x198   :  { %173 = vsyncpa [#allocation3], 1 }
 0x199   :  { %174 = vsyncpa [#allocation4], 1 }

</bundles_post_ra>
